<compile_context>
chip_gen: v7x
topology: tpu7x:2x2x1
jax: 0.10.0
libtpu: 0.0.40
codegen_flags: <defaults>
</compile_context>

<pallas_src>
import jax
import jax.numpy as jnp
from jax.experimental import pallas as pl
from jax.experimental.pallas import tpu as pltpu


def _net_attack_kernel(x_ref, w1_ref, b1_ref, w2_ref, b2_ref, o_ref):
    # fc1 + ReLU (f32; K=N=32 so the MXU time is irrelevant next to the x stream).
    h = jnp.dot(x_ref[...], w1_ref[...], preferred_element_type=jnp.float32)
    h = jnp.maximum(h + b1_ref[...], 0.0)

    # fc2 logits: (tb, 2).
    logits = jnp.dot(h, w2_ref[...], preferred_element_type=jnp.float32) + b2_ref[...]

    # Dropout: identity in eval mode (no-op).
    # 2-class softmax in sigmoid form:  softmax_i = sigmoid(l_i - l_other)
    # with l_other = sum(l) - l_i  ->  1 / (1 + exp(sum - 2*l_i)).
    # Exact (no approx reciprocal), overflow-safe, no max reduction needed.
    s = jnp.sum(logits, axis=1, keepdims=True)
    o_ref[...] = (1.0 / (1.0 + jnp.exp(s - 2.0 * logits))).astype(o_ref.dtype)


def net_attack_forward(x, w1, b1, w2, b2, *, block_rows=2048):
    """Forward pass of Net_attack.

    x:  (..., input_size)        -- flattened to (-1, input_size) like x.view().
    w1: (input_size, h_neurons)  -- fc1 weight stored pre-transposed (in, out).
    b1: (h_neurons,) or (1, H)   -- fc1 bias.
    w2: (h_neurons, 2)           -- fc2 weight stored pre-transposed.
    b2: (2,) or (1, 2)           -- fc2 bias.
    Returns float32 (batch, 2) softmax probabilities.
    """
    input_size, hidden = w1.shape
    out_dim = w2.shape[1]

    # Match PyTorch's x.view(-1, input_size); metadata-only for contiguous x.
    x2d = x.reshape(-1, input_size)
    batch = x2d.shape[0]

    b1_f = b1.reshape(1, hidden).astype(jnp.float32)
    b2_f = b2.reshape(1, out_dim).astype(jnp.float32)

    # Row tile: single grid step for common batches; otherwise a multiple of 8
    # (f32 sublane) with a cdiv grid.  No batch padding: the ragged last tile's
    # out-of-range rows hold undefined data, but every row is independent and
    # their writeback is masked by Pallas, so they never contaminate results.
    if batch <= block_rows:
        tb = batch
        n_tiles = 1
    else:
        tb = max(8, (block_rows // 8) * 8)
        n_tiles = pl.cdiv(batch, tb)

    cost = pl.CostEstimate(
        flops=2 * batch * (input_size * hidden + hidden * out_dim),
        transcendentals=batch * out_dim,
        bytes_accessed=(x2d.size * x2d.dtype.itemsize
                        + batch * out_dim * 4
                        + w1.size * w1.dtype.itemsize
                        + w2.size * w2.dtype.itemsize
                        + b1_f.size * 4 + b2_f.size * 4),
    )

    return pl.pallas_call(
        _net_attack_kernel,
        out_shape=jax.ShapeDtypeStruct((batch, out_dim), jnp.float32),
        grid_spec=pltpu.PrefetchScalarGridSpec(
            num_scalar_prefetch=0,
            grid=(n_tiles,),
            in_specs=[
                # Batch tile of activations: marches with the grid.
                pl.BlockSpec((tb, input_size), lambda i: (i, 0)),
                # Weights / biases: constant index_map -> stay VMEM-resident.
                pl.BlockSpec((input_size, hidden), lambda i: (0, 0)),
                pl.BlockSpec((1, hidden), lambda i: (0, 0)),
                pl.BlockSpec((hidden, out_dim), lambda i: (0, 0)),
                pl.BlockSpec((1, out_dim), lambda i: (0, 0)),
            ],
            out_specs=pl.BlockSpec((tb, out_dim), lambda i: (i, 0)),
        ),
        compiler_params=pltpu.CompilerParams(
            dimension_semantics=("parallel",)),
        cost_estimate=cost,
    )(x2d, w1, b1_f, w2, b2_f)


def _reference(x, w1, b1, w2, b2):
    # Pure-JAX reference of the PyTorch forward (f32 everywhere).
    x2d = x.reshape(-1, w1.shape[0]).astype(jnp.float32)
    h = jnp.maximum(x2d @ w1 + b1.reshape(1, -1), 0.0)
    logits = h @ w2 + b2.reshape(1, -1)
    return jax.nn.softmax(logits, axis=1)


if __name__ == "__main__":
    # Module hyper-parameters (small, consistent with the forward pass).
    input_size = 32
    h_neurons = 32
    batch = 8

    key = jax.random.PRNGKey(0)
    k_x, k_w1, k_b1, k_w2, k_b2, k_x2 = jax.random.split(key, 6)

    # Deterministic synthetic parameters (Linear weights stored as (in, out)).
    x = jax.random.normal(k_x, (batch, input_size), dtype=jnp.float32)
    w1 = jax.random.normal(k_w1, (input_size, h_neurons), dtype=jnp.float32) * 0.1
    b1 = jax.random.normal(k_b1, (1, h_neurons), dtype=jnp.float32) * 0.1
    w2 = jax.random.normal(k_w2, (h_neurons, 2), dtype=jnp.float32) * 0.1
    b2 = jax.random.normal(k_b2, (1, 2), dtype=jnp.float32) * 0.1

    # Small-batch path: single tile, single grid step.
    out = jax.block_until_ready(net_attack_forward(x, w1, b1, w2, b2))
    ref = _reference(x, w1, b1, w2, b2)
    assert out.shape == (batch, 2)
    # Modest tolerance: TPU matmul default precision vs the f32 reference.
    assert jnp.allclose(out, ref, atol=2e-2, rtol=2e-2)
    assert jnp.allclose(jnp.sum(out, axis=1), 1.0, atol=1e-4)

    # Larger batch, default tile: still a single grid step (600 <= 2048).
    xb = jax.random.normal(k_x2, (600, input_size), dtype=jnp.float32)
    out_b = jax.block_until_ready(net_attack_forward(xb, w1, b1, w2, b2))
    ref_b = _reference(xb, w1, b1, w2, b2)
    assert out_b.shape == (600, 2)
    assert jnp.allclose(out_b, ref_b, atol=2e-2, rtol=2e-2)
    assert jnp.allclose(jnp.sum(out_b, axis=1), 1.0, atol=1e-4)

    # Multi-tile path: cdiv grid with a ragged last tile (600 = 256+256+88).
    out_t = jax.block_until_ready(
        net_attack_forward(xb, w1, b1, w2, b2, block_rows=256))
    assert out_t.shape == (600, 2)
    assert jnp.allclose(out_t, ref_b, atol=2e-2, rtol=2e-2)
    assert jnp.allclose(jnp.sum(out_t, axis=1), 1.0, atol=1e-4)

    print("KERNEL_OK")
</pallas_src>

<mosaic_0001>
module attributes {stable_mosaic.version = 11 : i64} {
  func.func @_net_attack_kernel(%arg0: i32, %arg1: memref<8x32xf32, #tpu.memory_space<vmem>>, %arg2: memref<32x32xf32, #tpu.memory_space<vmem>>, %arg3: memref<1x32xf32, #tpu.memory_space<vmem>>, %arg4: memref<32x2xf32, #tpu.memory_space<vmem>>, %arg5: memref<1x2xf32, #tpu.memory_space<vmem>>, %arg6: memref<8x2xf32, #tpu.memory_space<vmem>>) attributes {dimension_semantics = [#tpu.dimension_semantics<parallel>], iteration_bounds = array<i64: 1>, scalar_prefetch = 0 : i64, scratch_operands = 0 : i64, tpu.core_type = #tpu.core_type<tc>, window_params = [{transform_indices = @transform_0, window_bounds = array<i64: 8, 32>}, {pipeline_mode = #tpu.pipeline_mode<synchronous>, transform_indices = @transform_1, window_bounds = array<i64: 32, 32>}, {pipeline_mode = #tpu.pipeline_mode<synchronous>, transform_indices = @transform_2, window_bounds = array<i64: 1, 32>}, {pipeline_mode = #tpu.pipeline_mode<synchronous>, transform_indices = @transform_3, window_bounds = array<i64: 32, 2>}, {pipeline_mode = #tpu.pipeline_mode<synchronous>, transform_indices = @transform_4, window_bounds = array<i64: 1, 2>}, {transform_indices = @transform_5, window_bounds = array<i64: 8, 2>}]} {
    %c0 = arith.constant 0 : index
    %c0_0 = arith.constant 0 : index
    %0 = vector.load %arg1[%c0, %c0_0] : memref<8x32xf32, #tpu.memory_space<vmem>>, vector<8x32xf32>
    %c0_1 = arith.constant 0 : index
    %c0_2 = arith.constant 0 : index
    %1 = vector.load %arg2[%c0_1, %c0_2] : memref<32x32xf32, #tpu.memory_space<vmem>>, vector<32x32xf32>
    %cst = arith.constant dense<0.000000e+00> : vector<8x32xf32>
    %2 = tpu.matmul %0, %1, %cst {dimension_numbers = #tpu.dot_dimension_numbers<[1], [0], [0], [1], [0, 0, 1, 1], [], []>} : vector<8x32xf32>, vector<32x32xf32>, vector<8x32xf32> -> vector<8x32xf32>
    %c0_3 = arith.constant 0 : index
    %c0_4 = arith.constant 0 : index
    %3 = vector.load %arg3[%c0_3, %c0_4] : memref<1x32xf32, #tpu.memory_space<vmem>>, vector<1x32xf32>
    %4 = vector.broadcast %3 : vector<1x32xf32> to vector<8x32xf32>
    %5 = arith.addf %2, %4 : vector<8x32xf32>
    %cst_5 = arith.constant 0.000000e+00 : f32
    %6 = vector.broadcast %cst_5 : f32 to vector<8x32xf32>
    %7 = arith.maximumf %5, %6 : vector<8x32xf32>
    %c0_6 = arith.constant 0 : index
    %c0_7 = arith.constant 0 : index
    %8 = vector.load %arg4[%c0_6, %c0_7] : memref<32x2xf32, #tpu.memory_space<vmem>>, vector<32x2xf32>
    %cst_8 = arith.constant dense<0.000000e+00> : vector<8x2xf32>
    %9 = tpu.matmul %7, %8, %cst_8 {dimension_numbers = #tpu.dot_dimension_numbers<[1], [0], [0], [1], [0, 0, 1, 1], [], []>} : vector<8x32xf32>, vector<32x2xf32>, vector<8x2xf32> -> vector<8x2xf32>
    %c0_9 = arith.constant 0 : index
    %c0_10 = arith.constant 0 : index
    %10 = vector.load %arg5[%c0_9, %c0_10] : memref<1x2xf32, #tpu.memory_space<vmem>>, vector<1x2xf32>
    %11 = vector.broadcast %10 : vector<1x2xf32> to vector<8x2xf32>
    %12 = arith.addf %9, %11 : vector<8x2xf32>
    %cst_11 = arith.constant dense<0.000000e+00> : vector<8xf32>
    %13 = vector.multi_reduction <add>, %12, %cst_11 [1] : vector<8x2xf32> to vector<8xf32>
    %14 = vector.shape_cast %13 : vector<8xf32> to vector<8x1xf32>
    %cst_12 = arith.constant 2.000000e+00 : f32
    %15 = vector.broadcast %cst_12 : f32 to vector<8x2xf32>
    %16 = arith.mulf %15, %12 : vector<8x2xf32>
    %17 = vector.broadcast %14 : vector<8x1xf32> to vector<8x2xf32>
    %18 = arith.subf %17, %16 : vector<8x2xf32>
    %19 = math.exp %18 : vector<8x2xf32>
    %cst_13 = arith.constant 1.000000e+00 : f32
    %20 = vector.broadcast %cst_13 : f32 to vector<8x2xf32>
    %21 = arith.addf %20, %19 : vector<8x2xf32>
    %cst_14 = arith.constant 1.000000e+00 : f32
    %22 = vector.broadcast %cst_14 : f32 to vector<8x2xf32>
    %23 = arith.divf %22, %21 : vector<8x2xf32>
    %c0_15 = arith.constant 0 : index
    %c0_16 = arith.constant 0 : index
    %24 = vector.load %arg6[%c0_15, %c0_16] : memref<8x2xf32, #tpu.memory_space<vmem>>, vector<8x2xf32>
    tpu.vector_store %arg6[%c0_15, %c0_16], %23 {strides = array<i32>} : memref<8x2xf32, #tpu.memory_space<vmem>>, vector<8x2xf32>,
    return
  }
  func.func @transform_0(%arg0: i32) -> (i32, i32) {
    %c0_i32 = arith.constant 0 : i32
    %c0_i32_0 = arith.constant 0 : i32
    return %arg0, %c0_i32 : i32, i32
  }
  func.func @transform_1(%arg0: i32) -> (i32, i32) {
    %c0_i32 = arith.constant 0 : i32
    %c0_i32_0 = arith.constant 0 : i32
    %c0_i32_1 = arith.constant 0 : i32
    return %c0_i32, %c0_i32_0 : i32, i32
  }
  func.func @transform_2(%arg0: i32) -> (i32, i32) {
    %c0_i32 = arith.constant 0 : i32
    %c0_i32_0 = arith.constant 0 : i32
    %c0_i32_1 = arith.constant 0 : i32
    return %c0_i32, %c0_i32_0 : i32, i32
  }
  func.func @transform_3(%arg0: i32) -> (i32, i32) {
    %c0_i32 = arith.constant 0 : i32
    %c0_i32_0 = arith.constant 0 : i32
    %c0_i32_1 = arith.constant 0 : i32
    return %c0_i32, %c0_i32_0 : i32, i32
  }
  func.func @transform_4(%arg0: i32) -> (i32, i32) {
    %c0_i32 = arith.constant 0 : i32
    %c0_i32_0 = arith.constant 0 : i32
    %c0_i32_1 = arith.constant 0 : i32
    return %c0_i32, %c0_i32_0 : i32, i32
  }
  func.func @transform_5(%arg0: i32) -> (i32, i32) {
    %c0_i32 = arith.constant 0 : i32
    %c0_i32_0 = arith.constant 0 : i32
    return %arg0, %c0_i32 : i32, i32
  }
}

</mosaic_0001>

<bundles_post_ra>
// kernel: tpu_custom_call.1
= control target key start
LH: loop header
LB: loop body
LE: loop exit
PB: predicated region body
PF: predicated region fallthrough
CT: control target
= control target key end

     0   :  { %10 = vsyncpa [#allocation3], 0  ;;  %s300_s18 = smov [#allocation2]   ;;  %s379_s0 = inlined_call_operand.hbm [shape: f32[8,32], index: 0, kind: input, shape index: {}]   ;;  %s380_s1 = inlined_call_operand.vmem [shape: f32[32,32], index: 1, kind: input, shape index: {}]   ;;  %s381_s2 = inlined_call_operand.vmem [shape: f32[1,32], index: 2, kind: input, shape index: {}]   ;;  %s382_s3 = inlined_call_operand.vmem [shape: f32[32,2], index: 3, kind: input, shape index: {}]   ;;  %s383_s4 = inlined_call_operand.vmem [shape: f32[1,2], index: 4, kind: input, shape index: {}]   ;;  %s384_s5 = inlined_call_operand.vmem [shape: f32[8,2], index: 5, kind: output, shape index: {}]  }
   0x1   :  { %s17_s19 = sshll.u32 %s300_s18, 4  ;;  %s276_s22 = scalar_lea.hbm %s379_s0, 128  ;;  %s18_s19 = int_to_ptr.vmem [resolvable:$true] %s17_s19 }
   0x2   :  { %p277_p0 = scmp.ne.s32.totalorder %s379_s0, %s276_s22  ;;  %p280_p1 = scmp.lt.u32.totalorder %s276_s22, %s379_s0 }
   0x4   :  { %p282_p2 = pnand %p280_p1, %p277_p0 }
   0x6   :  { %285 = shalt.err (!%p282_p2)
}
   0x7   :  { %s286_s27 = scalar_lea.vmem %s18_s19, 128  ;;  %p291_p4 = scmp.lt.s32.totalorder %s18_s19, %s18_s19 }
   0x8   :  { %p287_p3 = scmp.ne.s32.totalorder %s18_s19, %s286_s27  ;;  %p292_p5 = scmp.lt.s32.totalorder %s286_s27, %s286_s27 }
   0xa   :  { %p293_p6 = por %p292_p5, %p291_p4 }
   0xc   :  { %p294_p7 = pnand %p293_p6, %p287_p3 }
   0xe   :  { %297 = shalt.err (!%p294_p7)
}
   0xf   :  { %20 = dma.hbm_to_vmem [thread:$0]  %s379_s0, 128, %s18_s19, [#allocation3]  }
  0x10   :  { %298 = dma.done.wait [#allocation3], 128  }
  0x11   :  { %299 = vsyncadd [#allocation3], 4294967168  ;;  %v301_v0 = vmov 0.0|0.0   ;;  %vm302_vm0 = vmmov 0   ;;  %v303_v1 = vmov 0.0   ;;  %v33_v2 = vld [vmem:[%s380_s1] sm:$0xff] }
  0x12   :  { %256 = vmatprep.subr.bf16.mxu0 %v301_v0  ;;  %242 = vmatprep.mubr.msk.f32.mxu0 %vm302_vm0, %v303_v1  ;;  %v34_v3 = vld [vmem:[%s380_s1 + $0x8] sm:$0xff]  ;;  %v35_v4 = vld [vmem:[%s380_s1 + $0x10] sm:$0xff]  ;;  %v36_v6 = vld [vmem:[%s380_s1 + $0x18] sm:$0xff]  ;;  %vm44_vm1 = vcmask 261120   ;;  %vm203_vm2 = vcmask 15360  }
  0x13   :  { %262 = vmatprep.subr.bf16.mxu1 %v301_v0  ;;  %253 = vmatprep.mubr.msk.f32.mxu1 %vm302_vm0, %v303_v1  ;;  %v257_v5 = vpack.c.bf16 %v34_v3, %v33_v2  ;;  %v119_v7 = vld [vmem:[%s382_s3] sm:$0xff]  ;;  %v120_v8 = vld [vmem:[%s382_s3 + $0x8] sm:$0xff]  ;;  %v260_v9 = vpack.c.bf16 %v36_v6, %v35_v4  ;;  %v121_v12 = vld [vmem:[%s382_s3 + $0x10] sm:$0xff] }
  0x14   :  { %v263_v10 = vpack.c.bf16 %v120_v8, %v119_v7  ;;  %v32_v11 = vld [vmem:[#allocation2] sm:$0xff]  ;;  %v122_v13 = vld [vmem:[%s382_s3 + $0x18] sm:$0xff] }
  0x15   :  { %258 = vmatpush3.bf16.msra.mxu0 %v257_v5  ;;  %v266_v14 = vpack.c.bf16 %v122_v13, %v121_v12  ;;  %v220_v15 = vld [vmem:[%s381_s2] ss:$0 sm:$0xff] }
  0x16   :  { %259 = vmatprep.subr.bf16.mxu0 %v301_v0  ;;  %264 = vmatpush3.bf16.msra.mxu1 %v263_v10  ;;  %v222_v20 = vld [vmem:[%s383_s4] ss:$0 sm:$0xff] }
  0x17   :  { %265 = vmatprep.subr.bf16.mxu1 %v301_v0 }
  0x19   :  { %261 = vmatpush3.bf16.msra.mxu0 %v260_v9 }
  0x1a   :  { %267 = vmatpush3.bf16.msra.mxu1 %v266_v14 }
  0x1c   :  { %243 = vmatmul.mubr.msk.f32.vlgmr.msra.gmra.mrb[0].mxu0 %vm44_vm1, %v32_v11 }
  0xef   :  { %v114_v16 = vpop.f32.mrb[0].mxu0 }
  0xf0   :  { %v115_v17 = vadd.f32 %v220_v15, %v114_v16  ;;  %v244_v18 = vpop.f32.mrb[1].mxu0 }
  0xf2   :  { %v118_v19 = vmax.f32 %v115_v17, 0.0 }
  0xf4   :  { %254 = vmatmul.mubr.msk.f32.vlgmr.msra.gmra.mrb[0].mxu1 %vm44_vm1, %v118_v19 }
 0x1c7   :  { %v199_v21 = vpop.f32.mrb[0].mxu1 }
 0x1c8   :  { %v200_v22 = vadd.f32 %v222_v20, %v199_v21  ;;  %v255_v23 = vpop.f32.mrb[1].mxu1 }
 0x1ca   :  { %v204_v24 = vsel %vm203_vm2, %v200_v22, 0.0  ;;  %v207_v25 = vmul.f32 2.0, %v200_v22 }
 0x1cb   :  { %205 = vadd.xlane.f32.xlu0 %v204_v24 }
 0x258   :  { %v206_v26 = vpop.xlane.xlu0 %205 }
 0x259   :  { %v208_v27 = vsub.f32 %v206_v26, %v207_v25 }
 0x25b   :  { %v209_v28 = vmul.f32 1.442695, %v208_v27 }
 0x25d   :  { %272 = vpow2.f32 %v209_v28 }
 0x267   :  { %v273_v29 = vpop.eup %272 }
 0x268   :  { %v211_v30 = vadd.f32 1.0, %v273_v29 }
 0x26a   :  { %274 = vrcp.f32 %v211_v30 }
 0x274   :  { %v275_v31 = vpop.eup %274 }
 0x275   :  { %214 = vst.msk [vmem:[%s384_s5] sm:$0xff] %vm203_vm2, %v275_v31 }
 0x276   :  { %219 = vsyncpa [#allocation3], 1 }

</bundles_post_ra>
